<compile_context>
chip_gen: v7x
topology: tpu7x:2x2x1
jax: 0.10.0
libtpu: 0.0.40
codegen_flags: <defaults>
</compile_context>

<pallas_src>
import jax
import jax.numpy as jnp
from jax.experimental import pallas as pl
from jax.experimental.pallas import tpu as pltpu


# ---------------------------------------------------------------------------
# Kernels
# ---------------------------------------------------------------------------

def _bmm_tiled_kernel(a_ref, b_ref, o_ref, acc_ref):
    """Grid = (B, M//tm, N//tn, K//tk); batch dim squeezed out of refs.

    a_ref: (tm, tk), b_ref: (tk, tn), o_ref: (tm, tn), acc_ref: (tm, tn) f32.
    """
    @pl.when(pl.program_id(3) == 0)
    def _():
        acc_ref[...] = jnp.zeros_like(acc_ref)

    acc_ref[...] += jnp.dot(
        a_ref[...], b_ref[...], preferred_element_type=jnp.float32
    )

    @pl.when(pl.program_id(3) == pl.num_programs(3) - 1)
    def _():
        o_ref[...] = acc_ref[...].astype(o_ref.dtype)


def _bmm_small_kernel(a_ref, b_ref, o_ref):
    """Several whole batch elements per grid step (tiny per-batch matmuls).

    a_ref: (Bt, M, K), b_ref: (Bt, K, N), o_ref: (Bt, M, N).
    """
    o_ref[...] = jnp.einsum(
        "bmk,bkn->bmn", a_ref[...], b_ref[...],
        preferred_element_type=jnp.float32,
    ).astype(o_ref.dtype)


# ---------------------------------------------------------------------------
# Host-side wrapper
# ---------------------------------------------------------------------------

def _pick_tile(dim, candidates):
    """Largest candidate that evenly divides `dim`, else the full dim."""
    for c in candidates:
        if dim % c == 0:
            return c
    return dim


def _largest_divisor_leq(n, cap):
    for d in range(min(n, max(1, cap)), 0, -1):
        if n % d == 0:
            return d
    return 1


# Per-batch footprint (f32 bytes) under which we use the batched-small path.
_SMALL_PER_BATCH_BYTES = 1 << 20          # 1 MiB
_SMALL_PATH_STEP_BUDGET = 4 << 20         # ~4 MiB of tiles per grid step


def _bmm_3d(a: jax.Array, b: jax.Array) -> jax.Array:
    """a: (B, M, K), b: (B, K, N) -> (B, M, N) in the promoted input dtype."""
    B, M, K = a.shape
    Bb, Kb, N = b.shape
    assert B == Bb and K == Kb, (a.shape, b.shape)

    out_dtype = jnp.promote_types(a.dtype, b.dtype)
    cost = pl.CostEstimate(
        flops=2 * B * M * N * K,
        transcendentals=0,
        bytes_accessed=(a.size * a.dtype.itemsize
                        + b.size * b.dtype.itemsize
                        + B * M * N * jnp.dtype(out_dtype).itemsize),
    )

    per_batch_bytes = (M * K + K * N + M * N) * 4

    # ---- Small-matrix fast path: pack Bt batch elements per grid step. ----
    if B > 1 and per_batch_bytes <= _SMALL_PER_BATCH_BYTES:
        cap = min(16, max(1, _SMALL_PATH_STEP_BUDGET // per_batch_bytes))
        bt = _largest_divisor_leq(B, cap)
        return pl.pallas_call(
            _bmm_small_kernel,
            out_shape=jax.ShapeDtypeStruct((B, M, N), out_dtype),
            grid_spec=pltpu.PrefetchScalarGridSpec(
                num_scalar_prefetch=0,
                grid=(B // bt,),
                in_specs=[
                    pl.BlockSpec((bt, M, K), lambda bi: (bi, 0, 0)),
                    pl.BlockSpec((bt, K, N), lambda bi: (bi, 0, 0)),
                ],
                out_specs=pl.BlockSpec((bt, M, N), lambda bi: (bi, 0, 0)),
            ),
            compiler_params=pltpu.CompilerParams(
                dimension_semantics=("parallel",)
            ),
            cost_estimate=cost,
        )(a, b)

    # ---- General tiled path: (B, M, N, K) grid, f32 accumulator. ----
    # 256-lane tiles keep the v6e/v7x 2x256x256 MXU full and are 128-aligned
    # for v5e; ~5 MiB of double-buffered tiles fits every generation's default
    # scoped VMEM. Non-divisible dims fall back to the full extent (allowed by
    # the (8,128) rule since the block equals the array dim).
    tm = _pick_tile(M, (256, 128))
    tn = _pick_tile(N, (256, 128))
    tk = _pick_tile(K, (512, 256, 128))

    grid = (B, M // tm, N // tn, K // tk)
    return pl.pallas_call(
        _bmm_tiled_kernel,
        out_shape=jax.ShapeDtypeStruct((B, M, N), out_dtype),
        grid_spec=pltpu.PrefetchScalarGridSpec(
            num_scalar_prefetch=0,
            grid=grid,
            in_specs=[
                # Batch dim squeezed (None) -> kernel sees clean 2-D tiles.
                pl.BlockSpec((None, tm, tk), lambda bi, i, j, k: (bi, i, k)),
                pl.BlockSpec((None, tk, tn), lambda bi, i, j, k: (bi, k, j)),
            ],
            out_specs=pl.BlockSpec((None, tm, tn), lambda bi, i, j, k: (bi, i, j)),
            scratch_shapes=[pltpu.VMEM((tm, tn), jnp.float32)],
        ),
        compiler_params=pltpu.CompilerParams(
            dimension_semantics=("parallel", "parallel", "parallel", "arbitrary")
        ),
        cost_estimate=cost,
    )(a, b)


class BMM:
    """JAX/Pallas equivalent of the PyTorch BMM module."""

    def __init__(self, inp: jax.Array, mat2: jax.Array, batch: bool = False):
        self.batch = batch
        if self.batch:
            if inp.shape[0] != mat2.shape[0] or inp.shape[2] != mat2.shape[1]:
                raise ValueError(
                    f"input shape not matching the mat2 shape!!: "
                    f"inp_shape: {inp.shape} and mat2_shape: {mat2.shape}"
                )
        elif inp.shape[1] != mat2.shape[0]:
            raise ValueError(
                f"input shape not matching the mat2 shape!!: "
                f"inp_shape: {inp.shape} and mat2_shape: {mat2.shape}"
            )
        self.inp = inp
        self.mat2 = mat2

    def forward(self) -> jax.Array:
        if self.batch:
            return _bmm_3d(self.inp, self.mat2)
        # Non-batched: route through the same tiled kernel with B=1 (M/N grid
        # axes are "parallel", so both v7x TensorCores still get work).
        out = _bmm_3d(self.inp[None], self.mat2[None])
        return out[0]

    __call__ = forward


if __name__ == "__main__":
    key = jax.random.PRNGKey(0)
    k1, k2, k3, k4, k5, k6 = jax.random.split(key, 6)

    # 1) Batched small case (exercises the packed-batch small path).
    B, M, K, N = 2, 16, 32, 128
    inp_b = jax.random.normal(k1, (B, M, K), dtype=jnp.float32)
    mat2_b = jax.random.normal(k2, (B, K, N), dtype=jnp.float32)
    out_b = BMM(inp_b, mat2_b, batch=True)()
    jax.block_until_ready(out_b)
    ref_b = jnp.einsum("bmk,bkn->bmn", inp_b, mat2_b)
    assert out_b.shape == (B, M, N)
    assert out_b.dtype == jnp.float32
    assert jnp.allclose(out_b, ref_b, atol=1e-2, rtol=1e-2)

    # 2) Non-batched case (B=1 routed through the tiled kernel).
    inp_s = jax.random.normal(k3, (M, K), dtype=jnp.float32)
    mat2_s = jax.random.normal(k4, (K, N), dtype=jnp.float32)
    out_s = BMM(inp_s, mat2_s, batch=False)()
    jax.block_until_ready(out_s)
    ref_s = inp_s @ mat2_s
    assert out_s.shape == (M, N)
    assert jnp.allclose(out_s, ref_s, atol=1e-2, rtol=1e-2)

    # 3) Larger batched case (exercises (B, M, N, K) tiling + K accumulation).
    B2, M2, K2, N2 = 2, 256, 768, 256
    inp_l = jax.random.normal(k5, (B2, M2, K2), dtype=jnp.float32)
    mat2_l = jax.random.normal(k6, (B2, K2, N2), dtype=jnp.float32)
    out_l = BMM(inp_l, mat2_l, batch=True)()
    jax.block_until_ready(out_l)
    ref_l = jnp.einsum("bmk,bkn->bmn", inp_l, mat2_l)
    assert out_l.shape == (B2, M2, N2)
    assert jnp.allclose(out_l, ref_l, atol=1e-1, rtol=1e-2)

    # 4) bf16 inputs keep bf16 output (f32 accumulation inside the kernel).
    inp_h = inp_b.astype(jnp.bfloat16)
    mat2_h = mat2_b.astype(jnp.bfloat16)
    out_h = BMM(inp_h, mat2_h, batch=True)()
    jax.block_until_ready(out_h)
    assert out_h.dtype == jnp.bfloat16
    ref_h = jnp.einsum(
        "bmk,bkn->bmn", inp_h.astype(jnp.float32), mat2_h.astype(jnp.float32)
    )
    assert jnp.allclose(out_h.astype(jnp.float32), ref_h, atol=2e-1, rtol=5e-2)

    print("KERNEL_OK")
</pallas_src>

<mosaic_0001>
module attributes {stable_mosaic.version = 11 : i64} {
  func.func @_bmm_small_kernel(%arg0: i32, %arg1: memref<2x16x32xf32, #tpu.memory_space<vmem>>, %arg2: memref<2x32x128xf32, #tpu.memory_space<vmem>>, %arg3: memref<2x16x128xf32, #tpu.memory_space<vmem>>) attributes {dimension_semantics = [#tpu.dimension_semantics<parallel>], iteration_bounds = array<i64: 1>, scalar_prefetch = 0 : i64, scratch_operands = 0 : i64, tpu.core_type = #tpu.core_type<tc>, window_params = [{transform_indices = @transform_0, window_bounds = array<i64: 2, 16, 32>}, {transform_indices = @transform_1, window_bounds = array<i64: 2, 32, 128>}, {transform_indices = @transform_2, window_bounds = array<i64: 2, 16, 128>}]} {
    %c0 = arith.constant 0 : index
    %c0_0 = arith.constant 0 : index
    %c0_1 = arith.constant 0 : index
    %0 = vector.load %arg1[%c0, %c0_0, %c0_1] : memref<2x16x32xf32, #tpu.memory_space<vmem>>, vector<2x16x32xf32>
    %c0_2 = arith.constant 0 : index
    %c0_3 = arith.constant 0 : index
    %c0_4 = arith.constant 0 : index
    %1 = vector.load %arg2[%c0_2, %c0_3, %c0_4] : memref<2x32x128xf32, #tpu.memory_space<vmem>>, vector<2x32x128xf32>
    "tpu.trace_start"() <{level = 10 : i32, message = "bmk,bkn->bmn"}> : () -> ()
    %cst = arith.constant dense<0.000000e+00> : vector<2x16x128xf32>
    %2 = tpu.matmul %0, %1, %cst {dimension_numbers = #tpu.dot_dimension_numbers<[2], [1], [1], [2], [0, 0, 0, 1, 1, 2], [0], [0]>} : vector<2x16x32xf32>, vector<2x32x128xf32>, vector<2x16x128xf32> -> vector<2x16x128xf32>
    "tpu.trace_stop"() : () -> ()
    %c0_5 = arith.constant 0 : index
    %c0_6 = arith.constant 0 : index
    %c0_7 = arith.constant 0 : index
    %3 = vector.load %arg3[%c0_5, %c0_6, %c0_7] : memref<2x16x128xf32, #tpu.memory_space<vmem>>, vector<2x16x128xf32>
    tpu.vector_store %arg3[%c0_5, %c0_6, %c0_7], %2 {strides = array<i32>} : memref<2x16x128xf32, #tpu.memory_space<vmem>>, vector<2x16x128xf32>,
    return
  }
  func.func @transform_0(%arg0: i32) -> (i32, i32, i32) {
    %c0_i32 = arith.constant 0 : i32
    %c0_i32_0 = arith.constant 0 : i32
    %c0_i32_1 = arith.constant 0 : i32
    return %arg0, %c0_i32, %c0_i32_0 : i32, i32, i32
  }
  func.func @transform_1(%arg0: i32) -> (i32, i32, i32) {
    %c0_i32 = arith.constant 0 : i32
    %c0_i32_0 = arith.constant 0 : i32
    %c0_i32_1 = arith.constant 0 : i32
    return %arg0, %c0_i32, %c0_i32_0 : i32, i32, i32
  }
  func.func @transform_2(%arg0: i32) -> (i32, i32, i32) {
    %c0_i32 = arith.constant 0 : i32
    %c0_i32_0 = arith.constant 0 : i32
    %c0_i32_1 = arith.constant 0 : i32
    return %arg0, %c0_i32, %c0_i32_0 : i32, i32, i32
  }
}

</mosaic_0001>

<bundles_post_ra>
// kernel: tpu_custom_call.1
= control target key start
LH: loop header
LB: loop body
LE: loop exit
PB: predicated region body
PF: predicated region fallthrough
CT: control target
= control target key end

     0   :  { %7 = vsyncpa [#allocation3], 0  ;;  %s437_s0 = inlined_call_operand.hbm [shape: f32[2,16,32], index: 0, kind: input, shape index: {}]   ;;  %s438_s1 = inlined_call_operand.hbm [shape: f32[2,32,128], index: 1, kind: input, shape index: {}]   ;;  %s439_s2 = inlined_call_operand.hbm [shape: f32[2,16,128], index: 2, kind: output, shape index: {}]  }
   0x1   :  { %8 = vsyncpa [#allocation6], 0 }
   0x2   :  { %9 = vsyncpa [#allocation4], 0  ;;  %s368_s9 = smov [#allocation2]   ;;  %s296_s13 = scalar_lea.hbm %s437_s0, 512 }
   0x3   :  { %s15_s10 = sshll.u32 %s368_s9, 4  ;;  %p297_p0 = scmp.ne.s32.totalorder %s437_s0, %s296_s13  ;;  %s16_s10 = int_to_ptr.vmem [resolvable:$true] %s15_s10 }
   0x4   :  { %p300_p1 = scmp.lt.u32.totalorder %s296_s13, %s437_s0 }
   0x6   :  { %p302_p2 = pnand %p300_p1, %p297_p0 }
   0x8   :  { %305 = shalt.err (!%p302_p2)
}
   0x9   :  { %s306_s18 = scalar_lea.vmem %s16_s10, 512  ;;  %p311_p4 = scmp.lt.s32.totalorder %s16_s10, %s16_s10 }
   0xa   :  { %p307_p3 = scmp.ne.s32.totalorder %s16_s10, %s306_s18  ;;  %p312_p5 = scmp.lt.s32.totalorder %s306_s18, %s306_s18 }
   0xc   :  { %p313_p6 = por %p312_p5, %p311_p4 }
   0xe   :  { %p314_p7 = pnand %p313_p6, %p307_p3 }
  0x10   :  { %317 = shalt.err (!%p314_p7)
}
  0x11   :  { %s369_s19 = smov 128   ;;  %s370_s20 = smov 8  }
  0x12   :  { %21 = dma.hbm_to_vmem [thread:$0]  %s437_s0, 512, %s16_s10, [#allocation3], %s369_s19, %s369_s19, %s370_s20  }
  0x13   :  { %s371_s23 = smov [#allocation5]   ;;  %s318_s27 = scalar_lea.hbm %s438_s1, 1024 }
  0x14   :  { %s27_s24 = sshll.u32 %s371_s23, 4  ;;  %p319_p8 = scmp.ne.s32.totalorder %s438_s1, %s318_s27  ;;  %s28_s24 = int_to_ptr.vmem [resolvable:$true] %s27_s24 }
  0x15   :  { %p322_p9 = scmp.lt.u32.totalorder %s318_s27, %s438_s1 }
  0x17   :  { %p324_p10 = pnand %p322_p9, %p319_p8 }
  0x19   :  { %327 = shalt.err (!%p324_p10)
}
  0x1a   :  { %s328_s4 = scalar_lea.vmem %s28_s24, 1024  ;;  %p333_p12 = scmp.lt.s32.totalorder %s28_s24, %s28_s24 }
  0x1b   :  { %p329_p11 = scmp.ne.s32.totalorder %s28_s24, %s328_s4  ;;  %p334_p13 = scmp.lt.s32.totalorder %s328_s4, %s328_s4 }
  0x1d   :  { %p335_p0 = por %p334_p13, %p333_p12 }
  0x1f   :  { %p336_p1 = pnand %p335_p0, %p329_p11 }
  0x21   :  { %339 = shalt.err (!%p336_p1)
}
  0x22   :  { %33 = dma.hbm_to_vmem [thread:$0]  %s438_s1, 1024, %s28_s24, [#allocation6], %s369_s19, %s369_s19, %s370_s20  }
  0x23   :  { %362 = dma.done.wait [#allocation3], 512  }
  0x24   :  { %363 = vsyncadd [#allocation3], 4294966784 }
  0x25   :  { %364 = dma.done.wait [#allocation6], 1024  }
  0x26   :  { %365 = vsyncadd [#allocation6], 4294966272  ;;  %v44_v0 = vld [vmem:[#allocation5] sm:$0xff]  ;;  %v45_v1 = vld [vmem:[#allocation5 + $0x8] sm:$0xff]  ;;  %vm52_vm0 = vcmask 261120   ;;  %s372_s1 = smov [#allocation7]  }
  0x27   :  { %v48_v2 = vld [vmem:[#allocation5 + $0x20] sm:$0xff]  ;;  %v275_v3 = vpack.c.bf16 %v45_v1, %v44_v0  ;;  %v49_v4 = vld [vmem:[#allocation5 + $0x28] sm:$0xff]  ;;  %v46_v5 = vld [vmem:[#allocation5 + $0x10] sm:$0xff]  ;;  %s224_s6 = sshll.u32 %s372_s1, 4  ;;  %s225_s6 = int_to_ptr.vmem [resolvable:$true] %s224_s6 }
  0x28   :  { %v47_v6 = vld [vmem:[#allocation5 + $0x18] sm:$0xff]  ;;  %v283_v7 = vpack.c.bf16 %v49_v4, %v48_v2  ;;  %v50_v9 = vld [vmem:[#allocation5 + $0x30] sm:$0xff]  ;;  %v40_v11 = vld [vmem:[#allocation2] sm:$0xff]  ;;  %s340_s7 = scalar_lea.vmem %s225_s6, 512  ;;  %p345_p3 = scmp.lt.s32.totalorder %s225_s6, %s225_s6 }
  0x29   :  { %v279_v8 = vpack.c.bf16 %v47_v6, %v46_v5  ;;  %v51_v10 = vld [vmem:[#allocation5 + $0x38] sm:$0xff]  ;;  %276 = vmatprep.subr.bf16.mxu0 %v275_v3  ;;  %261 = vmatprep.mubr.msk.f32.mxu0 %vm52_vm0, %v40_v11  ;;  %v42_v13 = vld [vmem:[#allocation2 + $0x10] sm:$0xff]  ;;  %v41_v14 = vld [vmem:[#allocation2 + $0x8] sm:$0xff]  ;;  %p341_p2 = scmp.ne.s32.totalorder %s225_s6, %s340_s7  ;;  %p346_p4 = scmp.lt.s32.totalorder %s340_s7, %s340_s7 }
  0x2a   :  { %v287_v12 = vpack.c.bf16 %v51_v10, %v50_v9  ;;  %284 = vmatprep.subr.bf16.mxu1 %v283_v7  ;;  %278 = vmatpush3.bf16.msra.mxu0 %v275_v3  ;;  %v43_v15 = vld [vmem:[#allocation2 + $0x18] sm:$0xff] }
  0x2b   :  { %286 = vmatpush3.bf16.msra.mxu1 %v283_v7  ;;  %280 = vmatprep.subr.bf16.mxu0 %v279_v8  ;;  %p347_p5 = por %p346_p4, %p345_p3 }
  0x2c   :  { %288 = vmatprep.subr.bf16.mxu1 %v287_v12  ;;  %272 = vmatprep.mubr.msk.f32.mxu1 %vm52_vm0, %v42_v13 }
  0x2d   :  { %p348_p6 = pnand %p347_p5, %p341_p2 }
  0x2e   :  { %282 = vmatpush3.bf16.msra.mxu0 %v279_v8 }
  0x2f   :  { %290 = vmatpush3.bf16.msra.mxu1 %v287_v12 }
  0x31   :  { %262 = vmatmul.mubr.msk.f32.vlgmr.msra.gmra.mrb[0].mxu0 %vm52_vm0, %v41_v14 }
  0x32   :  { %273 = vmatmul.mubr.msk.f32.vlgmr.msra.gmra.mrb[0].mxu1 %vm52_vm0, %v43_v15 }
 0x104   :  { %v263_v16 = vpop.f32.mrb[0].mxu0 }
 0x105   :  { %216 = vst [vmem:[#allocation7 + $0x8] sm:$0xff] %v263_v16  ;;  %v274_v17 = vpop.f32.mrb[0].mxu1  ;;  %v125_v18 = vpop.f32.mrb[1].mxu0 }
 0x106   :  { %218 = vst [vmem:[#allocation7 + $0x18] sm:$0xff] %v274_v17  ;;  %215 = vst [vmem:[#allocation7] sm:$0xff] %v125_v18  ;;  %v206_v19 = vpop.f32.mrb[1].mxu1 }
 0x107   :  { %217 = vst [vmem:[#allocation7 + $0x10] sm:$0xff] %v206_v19 }
 0x108   :  { %351 = shalt.err (!%p348_p6)
}
 0x109   :  { %s352_s10 = scalar_lea.hbm %s439_s2, 512 }
 0x10a   :  { %p353_p7 = scmp.ne.s32.totalorder %s439_s2, %s352_s10  ;;  %p356_p8 = scmp.lt.u32.totalorder %s352_s10, %s439_s2 }
 0x10c   :  { %p358_p9 = pnand %p356_p8, %p353_p7 }
 0x10e   :  { %361 = shalt.err (!%p358_p9)
}
 0x10f   :  { %230 = dma.vmem_to_hbm [thread:$0]  %s225_s6, 512, %s439_s2, [#allocation4], %s369_s19, %s369_s19, %s370_s20  }
 0x110   :  { %366 = dma.done.wait [#allocation4], 512  }
 0x111   :  { %367 = vsyncadd [#allocation4], 4294966784 }
 0x112   :  { %234 = vsyncpa [#allocation3], 1 }
 0x113   :  { %235 = vsyncpa [#allocation6], 1 }
 0x114   :  { %236 = vsyncpa [#allocation4], 1 }

</bundles_post_ra>
